<compile_context>
chip_gen: v6e
topology: v6e:2x2x1
jax: 0.10.0
libtpu: 0.0.40
codegen_flags: <defaults>
</compile_context>

<pallas_src>
import functools

import jax
import jax.numpy as jnp
from jax import lax
from jax.experimental import pallas as pl
from jax.experimental.pallas import tpu as pltpu

LANE = 128


def _attention_kernel(x_ref, wqkv_ref, bqkv_ref, o_ref, acc_ref, *, inv_t):
    """Grid = (batch block, K tile).  Each K tile accumulates its slice of the
    fused QKV projection into acc_ref; the last K tile runs the softmax and
    the time-mean and writes the context vector."""
    kstep = pl.program_id(1)
    nk = pl.num_programs(1)
    Bb, T, tk = x_ref.shape
    Hp = wqkv_ref.shape[1] // 3

    @pl.when(kstep == 0)
    def _():
        acc_ref[...] = jnp.zeros_like(acc_ref)

    # Partial fused QKV projection for this K tile: bf16 MXU, f32 accumulate.
    x2 = x_ref[...].reshape(Bb * T, tk)
    acc_ref[...] += jnp.dot(x2, wqkv_ref[...],
                            preferred_element_type=jnp.float32)

    @pl.when(kstep == nk - 1)
    def _():
        qkv = acc_ref[...] + bqkv_ref[...]               # (Bb*T, 3*Hp) f32
        # Slices land on 128-lane tile boundaries -> no relayout copies.
        q = qkv[:, 0 * Hp:1 * Hp].reshape(Bb, T, Hp)
        kp = qkv[:, 1 * Hp:2 * Hp].reshape(Bb, T, Hp)
        v = qkv[:, 2 * Hp:3 * Hp].reshape(Bb, T, Hp)

        # scores = (x W_q / sqrt(H) + b_q/sqrt(H)) k^T: the scale is already
        # folded into W_q/b_q; transpose absorbed into the contraction;
        # bf16 operands for the native MXU path, f32 accumulation.
        scores = lax.dot_general(
            q.astype(jnp.bfloat16), kp.astype(jnp.bfloat16),
            dimension_numbers=(((2,), (2,)), ((0,), (0,))),
            preferred_element_type=jnp.float32)          # (Bb, T, T)

        # TODO(synk): for production T >~ 1k, tile the key axis with an
        # online-softmax accumulator instead of materializing (Bb, T, T).
        m = jnp.max(scores, axis=-1, keepdims=True)
        e = jnp.exp(scores - m)
        denom = jnp.sum(e, axis=-1, keepdims=True)
        # EUP approx reciprocal, with the 1/T of the time-mean folded in.
        r = pl.reciprocal(denom, approx=True) * inv_t    # (Bb, T, 1)

        # mean_t(attn @ v) == (mean_t attn) @ v: collapse to per-key weights
        # and a VPU broadcast-multiply + sublane reduce (no M=1 MXU matvec).
        w = jnp.sum(e * r, axis=1)                       # (Bb, T)
        ctx = jnp.sum(w[:, :, None] * v, axis=1)         # (Bb, Hp)
        o_ref[...] = ctx[:, None, :].astype(o_ref.dtype)


def fuse_qkv_params(wq, bq, wk, bk, wv, bv, *, lane=LANE):
    """Fuse + pad the Q/K/V projection params ONCE per model (not per call).

    Weights are (H_in, H_out) — transpose of nn.Linear's layout; the kernel
    computes x @ W + b.  The 1/sqrt(H) attention scale is folded into
    W_q / b_q, the hidden dim is zero-padded to a 128-lane multiple, and the
    fused weight is cast to bf16 for the MXU; the fused bias stays f32.
    """
    H = wq.shape[0]
    Hp = -(-H // lane) * lane
    ph = Hp - H
    scale = 1.0 / float(H) ** 0.5

    def pad_w(w, s=1.0):
        return jnp.pad(w.astype(jnp.float32) * s, ((0, ph), (0, ph)))

    def pad_b(b, s=1.0):
        return jnp.pad(b.reshape(1, H).astype(jnp.float32) * s,
                       ((0, 0), (0, ph)))

    wqkv = jnp.concatenate([pad_w(wq, scale), pad_w(wk), pad_w(wv)], axis=1)
    bqkv = jnp.concatenate([pad_b(bq, scale), pad_b(bk), pad_b(bv)], axis=1)
    return wqkv.astype(jnp.bfloat16), bqkv               # (Hp, 3Hp), (1, 3Hp)


def _pick_block_b(B, T):
    bb = max(1, -(-256 // T))        # aim Bb*T ~ 256: fill MXU rows (v6e/v7x)
    bb = min(bb, B)
    if B >= 2:
        bb = min(bb, (B + 1) // 2)   # >= 2 grid steps so both v7x TCs get work
    return bb


def _pick_block_k(Hp):
    if Hp <= 512:
        return Hp
    for tk in (512, 384, 256, 128):  # Hp is a multiple of 128, 128 always fits
        if Hp % tk == 0:
            return tk
    return LANE


@functools.partial(jax.jit,
                   static_argnames=("hidden_size", "block_b", "block_k"))
def attention_layer(x, wqkv, bqkv, *, hidden_size, block_b=None, block_k=None):
    """x: (B, T, H) f32/bf16; wqkv/bqkv from fuse_qkv_params.
    Returns the context vector (B, H) — time-mean of the attention output."""
    B, T, H = x.shape
    assert H == hidden_size
    Hp = wqkv.shape[0]
    assert wqkv.shape[1] == 3 * Hp and H <= Hp

    Bb = block_b if block_b is not None else _pick_block_b(B, T)
    Bp = -(-B // Bb) * Bb
    tk = block_k if block_k is not None else _pick_block_k(Hp)
    nk = Hp // tk

    # bf16 activations for the MXU; pad only when not already lane/batch
    # aligned (the production H % 128 == 0 case skips the extra HBM copy).
    xb = x.astype(jnp.bfloat16)
    if (Bp, Hp) != (B, H):
        xb = jnp.pad(xb, ((0, Bp - B), (0, 0), (0, Hp - H)))

    kernel = functools.partial(_attention_kernel, inv_t=1.0 / T)

    out = pl.pallas_call(
        kernel,
        out_shape=jax.ShapeDtypeStruct((Bp, 1, Hp), jnp.float32),
        grid_spec=pltpu.PrefetchScalarGridSpec(
            num_scalar_prefetch=0,
            grid=(Bp // Bb, nk),
            in_specs=[
                pl.BlockSpec((Bb, T, tk), lambda b, k: (b, 0, k)),     # x
                pl.BlockSpec((tk, 3 * Hp), lambda b, k: (k, 0)),       # W_qkv
                pl.BlockSpec((1, 3 * Hp), lambda b, k: (0, 0)),        # b_qkv
            ],
            out_specs=pl.BlockSpec((Bb, 1, Hp), lambda b, k: (b, 0, 0)),
            scratch_shapes=[pltpu.VMEM((Bb * T, 3 * Hp), jnp.float32)],
        ),
        compiler_params=pltpu.CompilerParams(
            dimension_semantics=("parallel", "arbitrary"),
            vmem_limit_bytes=48 * 1024 * 1024),
    )(xb, wqkv, bqkv)
    # TODO(synk): the PyTorch module also caches attention_weights (B, T, T)
    # for later inspection; not produced here (would need a second output).
    return out[:B, 0, :H]


def _reference(x, wq, bq, wk, bk, wv, bv):
    H = x.shape[-1]
    q = x @ wq + bq
    k = x @ wk + bk
    v = x @ wv + bv
    scores = jnp.einsum("btd,bsd->bts", q, k) / H ** 0.5
    attn = jax.nn.softmax(scores, axis=-1)
    ctx = jnp.einsum("bts,bsd->btd", attn, v)
    return jnp.mean(ctx, axis=1)


if __name__ == "__main__":
    B, T, H = 2, 8, 32
    key = jax.random.PRNGKey(0)
    kx, kq, kbq, kk, kbk, kv, kbv = jax.random.split(key, 7)

    # Deterministic params (uniform in [-1/sqrt(H), 1/sqrt(H)], matching
    # nn.Linear's default range), stored as (in, out).
    bound = 1.0 / H ** 0.5
    x = jax.random.normal(kx, (B, T, H), dtype=jnp.float32)
    wq = jax.random.uniform(kq, (H, H), jnp.float32, -bound, bound)
    bq = jax.random.uniform(kbq, (1, H), jnp.float32, -bound, bound)
    wk = jax.random.uniform(kk, (H, H), jnp.float32, -bound, bound)
    bk = jax.random.uniform(kbk, (1, H), jnp.float32, -bound, bound)
    wv = jax.random.uniform(kv, (H, H), jnp.float32, -bound, bound)
    bv = jax.random.uniform(kbv, (1, H), jnp.float32, -bound, bound)

    # Fuse / pad / scale the projection params once per model, not per call.
    wqkv, bqkv = fuse_qkv_params(wq, bq, wk, bk, wv, bv)

    out = attention_layer(x, wqkv, bqkv, hidden_size=H)
    out = jax.block_until_ready(out)

    ref = _reference(x, wq, bq, wk, bk, wv, bv)
    assert out.shape == (B, H)
    # bf16 MXU operands + approx softmax reciprocal => relaxed tolerance
    # (all accumulation and the softmax itself are f32).
    assert jnp.allclose(out, ref, atol=2e-2, rtol=2e-2), \
        float(jnp.max(jnp.abs(out - ref)))

    print("KERNEL_OK")
</pallas_src>

<mosaic_0001>
module attributes {stable_mosaic.version = 11 : i64} {
  func.func @_attention_kernel(%arg0: i32, %arg1: i32, %arg2: memref<1x8x128xbf16, #tpu.memory_space<vmem>>, %arg3: memref<128x384xbf16, #tpu.memory_space<vmem>>, %arg4: memref<1x384xf32, #tpu.memory_space<vmem>>, %arg5: memref<1x1x128xf32, #tpu.memory_space<vmem>>, %arg6: memref<8x384xf32, #tpu.memory_space<vmem>>) attributes {dimension_semantics = [#tpu.dimension_semantics<parallel>, #tpu.dimension_semantics<arbitrary>], iteration_bounds = array<i64: 2, 1>, scalar_prefetch = 0 : i64, scratch_operands = 1 : i64, tpu.core_type = #tpu.core_type<tc>, window_params = [{transform_indices = @transform_0, window_bounds = array<i64: 1, 8, 128>}, {transform_indices = @transform_1, window_bounds = array<i64: 128, 384>}, {pipeline_mode = #tpu.pipeline_mode<synchronous>, transform_indices = @transform_2, window_bounds = array<i64: 1, 384>}, {transform_indices = @transform_3, window_bounds = array<i64: 1, 1, 128>}]} {
    %c0_i32 = arith.constant 0 : i32
    %0 = arith.cmpi eq, %arg1, %c0_i32 : i32
    %1 = arith.extui %0 : i1 to i32
    %c0_i32_0 = arith.constant 0 : i32
    %2 = arith.cmpi ne, %1, %c0_i32_0 : i32
    scf.if %2 {
      %cst_11 = arith.constant 0.000000e+00 : f32
      %13 = vector.broadcast %cst_11 : f32 to vector<8x384xf32>
      %c0_12 = arith.constant 0 : index
      %c0_13 = arith.constant 0 : index
      %14 = vector.load %arg6[%c0_12, %c0_13] : memref<8x384xf32, #tpu.memory_space<vmem>>, vector<8x384xf32>
      tpu.vector_store %arg6[%c0_12, %c0_13], %13 {strides = array<i32>} : memref<8x384xf32, #tpu.memory_space<vmem>>, vector<8x384xf32>,
    } else {
    }
    %c0 = arith.constant 0 : index
    %c0_1 = arith.constant 0 : index
    %c0_2 = arith.constant 0 : index
    %3 = vector.load %arg2[%c0, %c0_1, %c0_2] : memref<1x8x128xbf16, #tpu.memory_space<vmem>>, vector<1x8x128xbf16>
    %4 = vector.shape_cast %3 : vector<1x8x128xbf16> to vector<8x128xbf16>
    %c0_3 = arith.constant 0 : index
    %c0_4 = arith.constant 0 : index
    %5 = vector.load %arg6[%c0_3, %c0_4] : memref<8x384xf32, #tpu.memory_space<vmem>>, vector<8x384xf32>
    %c0_5 = arith.constant 0 : index
    %c0_6 = arith.constant 0 : index
    %6 = vector.load %arg3[%c0_5, %c0_6] : memref<128x384xbf16, #tpu.memory_space<vmem>>, vector<128x384xbf16>
    %cst = arith.constant dense<0.000000e+00> : vector<8x384xf32>
    %7 = tpu.matmul %4, %6, %cst {dimension_numbers = #tpu.dot_dimension_numbers<[1], [0], [0], [1], [0, 0, 1, 1], [], []>} : vector<8x128xbf16>, vector<128x384xbf16>, vector<8x384xf32> -> vector<8x384xf32>
    %8 = arith.addf %5, %7 : vector<8x384xf32>
    %c0_7 = arith.constant 0 : index
    %c0_8 = arith.constant 0 : index
    %9 = vector.load %arg6[%c0_7, %c0_8] : memref<8x384xf32, #tpu.memory_space<vmem>>, vector<8x384xf32>
    tpu.vector_store %arg6[%c0_7, %c0_8], %8 {strides = array<i32>} : memref<8x384xf32, #tpu.memory_space<vmem>>, vector<8x384xf32>,
    %c0_i32_9 = arith.constant 0 : i32
    %10 = arith.cmpi eq, %arg1, %c0_i32_9 : i32
    %11 = arith.extui %10 : i1 to i32
    %c0_i32_10 = arith.constant 0 : i32
    %12 = arith.cmpi ne, %11, %c0_i32_10 : i32
    scf.if %12 {
      %c0_11 = arith.constant 0 : index
      %c0_12 = arith.constant 0 : index
      %13 = vector.load %arg6[%c0_11, %c0_12] : memref<8x384xf32, #tpu.memory_space<vmem>>, vector<8x384xf32>
      %c0_13 = arith.constant 0 : index
      %c0_14 = arith.constant 0 : index
      %14 = vector.load %arg4[%c0_13, %c0_14] : memref<1x384xf32, #tpu.memory_space<vmem>>, vector<1x384xf32>
      %15 = vector.broadcast %14 : vector<1x384xf32> to vector<8x384xf32>
      %16 = arith.addf %13, %15 : vector<8x384xf32>
      %17 = vector.extract_strided_slice %16 {offsets = [0, 0], sizes = [8, 128], strides = [1, 1]} : vector<8x384xf32> to vector<8x128xf32>
      %18 = vector.shape_cast %17 : vector<8x128xf32> to vector<1x8x128xf32>
      %19 = vector.extract_strided_slice %16 {offsets = [0, 128], sizes = [8, 128], strides = [1, 1]} : vector<8x384xf32> to vector<8x128xf32>
      %20 = vector.shape_cast %19 : vector<8x128xf32> to vector<1x8x128xf32>
      %21 = vector.extract_strided_slice %16 {offsets = [0, 256], sizes = [8, 128], strides = [1, 1]} : vector<8x384xf32> to vector<8x128xf32>
      %22 = vector.shape_cast %21 : vector<8x128xf32> to vector<1x8x128xf32>
      %23 = arith.truncf %18 : vector<1x8x128xf32> to vector<1x8x128xbf16>
      %24 = arith.truncf %20 : vector<1x8x128xf32> to vector<1x8x128xbf16>
      %cst_15 = arith.constant dense<0.000000e+00> : vector<1x8x8xf32>
      %25 = tpu.matmul %23, %24, %cst_15 {dimension_numbers = #tpu.dot_dimension_numbers<[2], [2], [1], [1], [0, 0, 0, 1, 1, 1], [0], [0]>} : vector<1x8x128xbf16>, vector<1x8x128xbf16>, vector<1x8x8xf32> -> vector<1x8x8xf32>
      %cst_16 = arith.constant dense<0xFF800000> : vector<1x8xf32>
      %26 = vector.multi_reduction <maximumf>, %25, %cst_16 [2] : vector<1x8x8xf32> to vector<1x8xf32>
      %27 = vector.shape_cast %26 : vector<1x8xf32> to vector<1x8x1xf32>
      %28 = vector.broadcast %27 : vector<1x8x1xf32> to vector<1x8x8xf32>
      %29 = arith.subf %25, %28 : vector<1x8x8xf32>
      %30 = math.exp %29 : vector<1x8x8xf32>
      %cst_17 = arith.constant dense<0.000000e+00> : vector<1x8xf32>
      %31 = vector.multi_reduction <add>, %30, %cst_17 [2] : vector<1x8x8xf32> to vector<1x8xf32>
      %32 = vector.shape_cast %31 : vector<1x8xf32> to vector<1x8x1xf32>
      %33 = tpu.reciprocal %32 {approx = true} : vector<1x8x1xf32> -> vector<1x8x1xf32>
      %cst_18 = arith.constant 1.250000e-01 : f32
      %34 = vector.broadcast %cst_18 : f32 to vector<1x8x1xf32>
      %35 = arith.mulf %33, %34 : vector<1x8x1xf32>
      %36 = vector.broadcast %35 : vector<1x8x1xf32> to vector<1x8x8xf32>
      %37 = arith.mulf %30, %36 : vector<1x8x8xf32>
      %cst_19 = arith.constant dense<0.000000e+00> : vector<1x8xf32>
      %38 = vector.multi_reduction <add>, %37, %cst_19 [1] : vector<1x8x8xf32> to vector<1x8xf32>
      %39 = vector.shape_cast %38 : vector<1x8xf32> to vector<1x8x1xf32>
      %40 = vector.broadcast %39 : vector<1x8x1xf32> to vector<1x8x128xf32>
      %41 = arith.mulf %40, %22 : vector<1x8x128xf32>
      %cst_20 = arith.constant dense<0.000000e+00> : vector<1x128xf32>
      %42 = vector.multi_reduction <add>, %41, %cst_20 [1] : vector<1x8x128xf32> to vector<1x128xf32>
      %43 = vector.shape_cast %42 : vector<1x128xf32> to vector<1x1x128xf32>
      %c0_21 = arith.constant 0 : index
      %c0_22 = arith.constant 0 : index
      %c0_23 = arith.constant 0 : index
      %44 = vector.load %arg5[%c0_21, %c0_22, %c0_23] : memref<1x1x128xf32, #tpu.memory_space<vmem>>, vector<1x1x128xf32>
      tpu.vector_store %arg5[%c0_21, %c0_22, %c0_23], %43 {strides = array<i32>} : memref<1x1x128xf32, #tpu.memory_space<vmem>>, vector<1x1x128xf32>,
    } else {
    }
    return
  }
  func.func @transform_0(%arg0: i32, %arg1: i32) -> (i32, i32, i32) {
    %c0_i32 = arith.constant 0 : i32
    %c0_i32_0 = arith.constant 0 : i32
    return %arg0, %c0_i32, %arg1 : i32, i32, i32
  }
  func.func @transform_1(%arg0: i32, %arg1: i32) -> (i32, i32) {
    %c0_i32 = arith.constant 0 : i32
    %c0_i32_0 = arith.constant 0 : i32
    return %arg1, %c0_i32 : i32, i32
  }
  func.func @transform_2(%arg0: i32, %arg1: i32) -> (i32, i32) {
    %c0_i32 = arith.constant 0 : i32
    %c0_i32_0 = arith.constant 0 : i32
    %c0_i32_1 = arith.constant 0 : i32
    return %c0_i32, %c0_i32_0 : i32, i32
  }
  func.func @transform_3(%arg0: i32, %arg1: i32) -> (i32, i32, i32) {
    %c0_i32 = arith.constant 0 : i32
    %c0_i32_0 = arith.constant 0 : i32
    %c0_i32_1 = arith.constant 0 : i32
    return %arg0, %c0_i32, %c0_i32_0 : i32, i32, i32
  }
}

</mosaic_0001>

<bundles_post_ra>
// kernel: attention_layer.1
= control target key start
LH: loop header
LB: loop body
LE: loop exit
PB: predicated region body
PF: predicated region fallthrough
CT: control target
= control target key end

     0   :  { %8 = vsyncpa [#allocation4], 0  ;;  %s1114_s0 = inlined_call_operand.vmem [shape: bf16[2,8,128], index: 0, kind: input, shape index: {}]   ;;  %s1115_s1 = inlined_call_operand.hbm [shape: bf16[128,384], index: 1, kind: input, shape index: {}]   ;;  %s1116_s2 = inlined_call_operand.vmem [shape: f32[1,384], index: 2, kind: input, shape index: {}]   ;;  %s1117_s3 = inlined_call_operand.hbm [shape: f32[2,1,128], index: 3, kind: output, shape index: {}]  }
   0x1   :  { %9 = vsyncpa [#allocation5], 0 }
   0x2   :  { %11 = vsyncpa [#allocation5 + $0x1], 0  ;;  %s978_s12 = smov 0   ;;  %s980_s13 = smov 0  }
   0x3   :  { %s982_s14 = smov 0   ;;  %s984_s15 = smov 0  }
   0x4   :  { %s986_s16 = smov 0   ;;  %s988_s17 = smov 0  }
   0x5 LB: > { %s664_s18 = sadd.s32 4294967295, %s949_s17   ;;  %s665_s19 = sadd.s32 4294967294, %s949_s17   ;;  %s949_s17 = sphi %s988_s17, %s17_s17   ;;  %s945_s16 = sphi %s986_s16, %s1126_s16   ;;  %s941_s15 = sphi %s984_s15, %s1125_s15   ;;  %s937_s14 = sphi %s982_s14, %s1124_s14   ;;  %s933_s13 = sphi %s980_s13, %s1123_s13   ;;  %s929_s12 = sphi %s978_s12, %s1122_s12  }
   0x6   : > { %s29_s20 = sadd.s32 1, %s945_s16  ;;  %s111_s21 = sadd.s32 1, %s937_s14 }
   0x7   : > { %p31_p0 = scmp.ge.s32.totalorder %s29_s20, 2  ;;  %p121_p1 = scmp.ne.s32.totalorder %s937_s14, %s933_s13 }
   0x8   : > { %p122_p2 = scmp.eq.s32.totalorder %s664_s18, 1  ;;  %p127_p3 = scmp.ne.s32.totalorder %s933_s13, %s929_s12 }
   0x9   : > { %s1128_s20 = smov (%p31_p0, %s29_s20), 0  ;;  %p128_p5 = scmp.eq.s32.totalorder %s665_s19, 1 }
   0xa   : > { %p1018_p4 = por %p122_p2, %p121_p1  ;;  %s108_s23 = ssub.s32 %s945_s16, %s1128_s20 }
   0xb   : > { %p666_p6 = scmp.ge.s32.totalorder %s949_s17, 1  ;;  %p109_p7 = scmp.eq.s32.totalorder %s108_s23, 0 }
   0xc   : > { %p1025_p8 = por %p128_p5, %p127_p3  ;;  %p135_p9 = scmp.lt.s32.totalorder %s949_s17, 3 }
   0xd   : > { %s1031_s25 = scalar_select %p109_p7, %s937_s14, %s111_s21  }
   0xe   : > { %p1033_p10 = pnand %p666_p6, %p135_p9  ;;  %p1037_p11 = scmp.eq.s32.totalorder %s664_s18, 0 }
   0xf   : > { %s951_s28 = smov [#allocation3]  }
  0x10   : > { %p742_p12 = pneg %p1033_p10  ;;  %s151_s29 = sshll.u32 %s951_s28, 4  ;;  %s152_s29 = int_to_ptr.vmem [resolvable:$true] %s151_s29 }
  0x11   : > { %s854_s30 = scalar_lea.vmem %s152_s29, 3072  ;;  %p862_p5 = scmp.lt.s32.totalorder %s152_s29, %s152_s29 }
  0x12   : > { %p743_p13 = pnand %p1037_p11, %p742_p12  ;;  %p855_p1 = scmp.ne.s32.totalorder %s152_s29, %s854_s30 }
  0x13   : > { %p863_p6 = scmp.lt.s32.totalorder %s854_s30, %s854_s30 }
  0x14   : > { %p845_p0 = pneg %p743_p13 }
  0x15   : > { %p864_p7 = por %p863_p6, %p862_p5 }
  0x16   : > { %p857_p2 = pnand %p855_p1, %p845_p0 }
  0x18   : > { %p858_p3 = pneg %p857_p2 }
  0x1a   : > { %p865_p9 = pnand %p864_p7, %p858_p3 }
  0x1c   : > { %868 = shalt.err (!%p865_p9)
}
  0x1d   : > { %s952_s4 = smov 192   ;;  %s953_s5 = smov 12  }
  0x1e   : > { %745 = dma.hbm_to_vmem [thread:$0]  (!%p743_p13), %s1115_s1, 3072, %s152_s29, [#allocation4], %s952_s4, %s952_s4, %s953_s5  }
  0x1f   : > { %180 = sbr.rel (%p1033_p10) target bundleno = 938 (0x3aa), region = 32 }
  0x24   : > { %920 = dma.done.wait (%p1037_p11), [#allocation4], 3072  }
  0x25   : > { %922 = vsyncadd (%p1037_p11), [#allocation4], 4294964224  ;;  %v954_v0 = vmov 0   ;;  %v807_v1 = vld [vmem:[#allocation3 + $0xac] ss:$12 sps:$4 sm:$0xff]   ;;  %p205_p10 = scmp.lt.s32.totalorder %s941_s15, 1  ;;  %v480_v19 = vlaneseq }
  0x26   : > { %417 = vmatprep.mubr.bf16.mxu0 %v954_v0  ;;  %v809_v2 = vld [vmem:[#allocation3 + $0xa8] ss:$12 sps:$4 sm:$0xff]   ;;  %385 = vmatprep.subr.bf16.mxu0 %v807_v1  ;;  %v812_v4 = vld [vmem:[#allocation3 + $0x90] ss:$12 sps:$4 sm:$0xff]   ;;  %v815_v6 = vld [vmem:[#allocation3 + $0x78] ss:$12 sps:$4 sm:$0xff]  }
  0x27   : > { %v810_v3 = vld [vmem:[#allocation3 + $0x94] ss:$12 sps:$4 sm:$0xff]   ;;  %386 = vmatpush1.bf16.msra.mxu0 %v809_v2  ;;  %v813_v5 = vld [vmem:[#allocation3 + $0x7c] ss:$12 sps:$4 sm:$0xff]   ;;  %v816_v7 = vld [vmem:[#allocation3 + $0x64] ss:$12 sps:$4 sm:$0xff]  }
  0x28   : > { %387 = vmatprep.subr.bf16.mxu0 %v810_v3  ;;  %v818_v8 = vld [vmem:[#allocation3 + $0x60] ss:$12 sps:$4 sm:$0xff]   ;;  %v821_v10 = vld [vmem:[#allocation3 + $0x48] ss:$12 sps:$4 sm:$0xff]   ;;  %v824_v12 = vld [vmem:[#allocation3 + $0x30] ss:$12 sps:$4 sm:$0xff]  }
  0x29   : > { %v819_v9 = vld [vmem:[#allocation3 + $0x4c] ss:$12 sps:$4 sm:$0xff]   ;;  %v822_v11 = vld [vmem:[#allocation3 + $0x34] ss:$12 sps:$4 sm:$0xff]   ;;  %v825_v13 = vld [vmem:[#allocation3 + $0x1c] ss:$12 sps:$4 sm:$0xff]  }
  0x2a   : > { %s206_s8 = scalar_select %p205_p10, %s941_s15, 1  ;;  %v827_v14 = vld [vmem:[#allocation3 + $0x18] ss:$12 sps:$4 sm:$0xff]   ;;  %v830_v16 = vld [vmem:[#allocation3] ss:$12 sps:$4 sm:$0xff]   ;;  %v955_v18 = vmov 0.0  }
  0x2b   : > { %388 = vmatpush1.bf16.msra.mxu0 %v812_v4  ;;  %v828_v15 = vld [vmem:[#allocation3 + $0x4] ss:$12 sps:$4 sm:$0xff]   ;;  %710 = vmatprep.subr.bf16.mxu1 %v955_v18  ;;  %vm956_vm0 = vmmov 0   ;;  %v1059_v20 = vshrl.u32 %v480_v19, 7  ;;  %v1065_v22 = vld [vmem:[%s1116_s2] sm:$0x7] }
  0x2c   : > { %389 = vmatprep.subr.bf16.mxu0 %v813_v5  ;;  %s671_s9 = sshll.u32 %s206_s8, 2  ;;  %726 = vmatprep.mubr.msk.bf16.mxu1 %vm956_vm0, %v955_v18  ;;  %vm540_vm1 = vcmask 64512   ;;  %v831_v39 = vld [vmem:[#allocation3 + $0xb0] ss:$12 sps:$4 sm:$0xff]   ;;  %v832_v40 = vld [vmem:[#allocation3 + $0x98] ss:$12 sps:$4 sm:$0xff]  }
  0x2d   : > { %s211_s18 = scalar_lea.vmem %s1114_s0, %s671_s9  ;;  %v486_v21 = vsub.s32 1, %v1059_v20  ;;  %v482_v25 = vsub.s32 0, %v1059_v20  ;;  %711 = vmatpush3.bf16.msra.mxu1 %v831_v39  ;;  %v833_v41 = vld [vmem:[#allocation3 + $0x80] ss:$12 sps:$4 sm:$0xff]   ;;  %v834_v42 = vld [vmem:[#allocation3 + $0x68] ss:$12 sps:$4 sm:$0xff]  }
  0x2e   : > { %v221_v17 = vld [vmem:[%s211_s18] sm:$0xf]  ;;  %712 = vmatprep.subr.bf16.mxu1 %v955_v18  ;;  %v835_v43 = vld [vmem:[#allocation3 + $0x50] ss:$12 sps:$4 sm:$0xff]   ;;  %v836_v44 = vld [vmem:[#allocation3 + $0x38] ss:$12 sps:$4 sm:$0xff]  }
  0x2f   : > { %390 = vmatpush1.bf16.msra.mxu0 %v815_v6  ;;  %v487_v23 = vrot.slane %v1065_v22, %v486_v21  ;;  %v483_v28 = vrot.slane %v1065_v22, %v482_v25  ;;  %v837_v45 = vld [vmem:[#allocation3 + $0x20] ss:$12 sps:$4 sm:$0xff]   ;;  %v838_v46 = vld [vmem:[#allocation3 + $0x8] ss:$12 sps:$4 sm:$0xff]   ;;  %v490_v3 = vsub.s32 2, %v1059_v20  ;;  %s203_s23 = sand.u32 1, %s933_s13  }
  0x30   : > { %391 = vmatprep.subr.bf16.mxu0 %v816_v7  ;;  %s696_s26 = sshll.u32 %s941_s15, 4  ;;  %s204_s27 = scalar_lea.vmem [#allocation6], %s203_s23 }
  0x31   : > { %713 = vmatpush3.bf16.msra.mxu1 %v832_v40  ;;  %v491_v4 = vrot.slane %v1065_v22, %v490_v3  ;;  %s584_s28 = sshll.u32 %s204_s27, 4  ;;  %s582_s4 = scalar_lea.hbm %s1117_s3, %s696_s26  ;;  %s585_s28 = int_to_ptr.vmem [resolvable:$true] %s584_s28 }
  0x32   : > { %714 = vmatprep.subr.bf16.mxu1 %v955_v18  ;;  %s572_s5 = scalar_lea.sflag [#allocation5], %s203_s23  ;;  %s869_s6 = scalar_lea.vmem %s585_s28, 16 }
  0x33   : > { %392 = vmatpush1.bf16.msra.mxu0 %v818_v8  ;;  %p870_p11 = scmp.ne.s32.totalorder %s585_s28, %s869_s6  ;;  %s957_s7 = smov [#allocation6]  }
  0x34   : > { %393 = vmatprep.subr.bf16.mxu0 %v819_v9  ;;  %s873_s8 = sshll.u32 %s957_s7, 4  ;;  %s874_s8 = int_to_ptr.vmem [resolvable:$false] %s873_s8 }
  0x35   : > { %715 = vmatpush3.bf16.msra.mxu1 %v833_v41  ;;  %p871_p12 = pnand %p870_p11, %p1018_p4  ;;  %s875_s15 = scalar_lea.vmem %s874_s8, 32 }
  0x36   : > { %716 = vmatprep.subr.bf16.mxu1 %v955_v18  ;;  %p876_p0 = scmp.lt.s32.totalorder %s585_s28, %s874_s8  ;;  %p877_p1 = scmp.lt.s32.totalorder %s875_s15, %s869_s6 }
  0x37   : > { %394 = vmatpush1.bf16.msra.mxu0 %v821_v10  ;;  %p872_p13 = pneg %p871_p12 }
  0x38   : > { %395 = vmatprep.subr.bf16.mxu0 %v822_v11  ;;  %p878_p2 = por %p877_p1, %p876_p0 }
  0x39   : > { %717 = vmatpush3.bf16.msra.mxu1 %v834_v42 }
  0x3a   : > { %718 = vmatprep.subr.bf16.mxu1 %v955_v18  ;;  %p879_p3 = pnand %p878_p2, %p872_p13 }
  0x3b   : > { %396 = vmatpush1.bf16.msra.mxu0 %v824_v12 }
  0x3c   : > { %397 = vmatprep.subr.bf16.mxu0 %v825_v13 }
  0x3d   : > { %719 = vmatpush3.bf16.msra.mxu1 %v835_v43 }
  0x3e   : > { %720 = vmatprep.subr.bf16.mxu1 %v955_v18 }
  0x3f   : > { %398 = vmatpush1.bf16.msra.mxu0 %v827_v14 }
  0x40   : > { %399 = vmatprep.subr.bf16.mxu0 %v828_v15 }
  0x41   : > { %721 = vmatpush3.bf16.msra.mxu1 %v836_v44 }
  0x42   : > { %722 = vmatprep.subr.bf16.mxu1 %v955_v18 }
  0x43   : > { %400 = vmatpush1.bf16.msra.mxu0 %v830_v16 }
  0x44   : > { %730 = vmatprep.subr.bf16.mxu0 %v955_v18 }
  0x45   : > { %723 = vmatpush3.bf16.msra.mxu1 %v837_v45 }
  0x46   : > { %418 = vmatmul.mubr.bf16.vlgmr.msra.gmra.mxu0 %v221_v17  ;;  %724 = vmatprep.subr.bf16.mxu1 %v955_v18 }
  0x47   : > { %732 = vmatprep.mubr.msk.bf16.mxu0 %vm956_vm0, %v955_v18 }
  0x49   : > { %725 = vmatpush3.bf16.msra.mxu1 %v838_v46 }
  0x4c   : > { %727 = vmatmul.mubr.bf16.vlgmr.msra.gmra.mxu1 %v221_v17 }
 0x106   : > { %v419_v24 = vpop.f32.mrf.mxu0 }
 0x107   : > { %v495_v32 = vadd.f32 %v483_v28, %v419_v24 }
 0x108   : > { %v421_v26 = vpop.f32.mrf.mxu0 }
 0x109   : > { %v496_v27 = vadd.f32 %v487_v23, %v421_v26  ;;  %v498_v33 = vpack.c.bf16 %v495_v32, %v495_v32 }
 0x10a   : > { %v423_v29 = vpop.f32.mrf.mxu0 }
 0x10b   : > { %v499_v30 = vpack.c.bf16 %v496_v27, %v496_v27 }
 0x10c   : > { %v424_v31 = vpop.f32.mrf.mxu0  ;;  %v460_v52 = vpop.f32.mrf.mxu1 }
 0x10d   : > { %731 = vmatpush3.bf16.xpose.msra.mxu0 %v499_v30  ;;  %v497_v5 = vadd.f32 %v491_v4, %v460_v52 }
 0x10e   : > { %v728_v53 = vpop.f32.mrf.mxu1 }
 0x110   : > { %v463_v54 = vpop.f32.mrf.mxu1 }
 0x112   : > { %v729_v55 = vpop.f32.mrf.mxu1 }
 0x114   : > { %733 = vmatmul.mubr.bf16.vlgmr.msra.gmra.mxu0 %v498_v33 }
 0x1d4   : > { %v534_v34 = vpop.f32.mrf.mxu0 }
 0x1d5   : > { %v541_v35 = vsel %vm540_vm1, %v534_v34, -inf }
 0x1d6   : > { %542 = vmax.xlane.f32.xlu0 %v541_v35  ;;  %v734_v36 = vpop.f32.mrf.mxu0 }
 0x1d8   : > { %v537_v37 = vpop.f32.mrf.mxu0 }
 0x1da   : > { %v735_v38 = vpop.f32.mrf.mxu0 }
 0x25f   : > { %v543_v47 = vpop.xlane.xlu0 %542 }
 0x260   : > { %v544_v48 = vsub.f32 %v534_v34, %v543_v47 }
 0x262   : > { %v545_v49 = vmul.f32 1.442695, %v544_v48 }
 0x264   : > { %839 = vpow2.f32 %v545_v49 }
 0x271   : > { %v840_v50 = vpop.eup %839 }
 0x272   : > { %v547_v51 = vsel %vm540_vm1, %v840_v50, 0.0 }
 0x273   : > { %548 = vadd.xlane.f32.xlu0 %v547_v51 }
 0x2fc   : > { %v549_v56 = vpop.xlane.xlu0 %548 }
 0x2fd   : > { %841 = vrcp.f32 %v549_v56 }
 0x30a   : > { %v842_v57 = vpop.eup %841 }
 0x30b   : > { %v551_v58 = vmul.f32 0.125, %v842_v57 }
 0x30d   : > { %v552_v59 = vmul.f32 %v840_v50, %v551_v58 }
 0x30f   : > { %v553_v60 = vsel %vm540_vm1, %v552_v59, 0.0 }
 0x310   : > { %v554_v61 = vrot.slane %v553_v60, 4 }
 0x312   : > { %v555_v62 = vadd.f32 %v554_v61, %v553_v60 }
 0x314   : > { %v556_v63 = vrot.slane %v555_v62, 2 }
 0x316   : > { %v557_v0 = vadd.f32 %v556_v63, %v555_v62 }
 0x318   : > { %v558_v1 = vrot.slane %v557_v0, 1 }
 0x31a   : > { %v559_v2 = vadd.f32 %v558_v1, %v557_v0 }
 0x31c   : > { %561 = vbcast.lane.b32.xlu1 %v559_v2, 256 }
 0x38e   : > { %v562_v6 = vpop.permute.xlu1 %561 }
 0x38f   : > { %v563_v7 = vmul.f32 %v562_v6, %v497_v5 }
 0x391   : > { %v564_v8 = vrot.slane %v563_v7, 4 }
 0x393   : > { %v565_v9 = vadd.f32 %v564_v8, %v563_v7 }
 0x395   : > { %v566_v10 = vrot.slane %v565_v9, 2 }
 0x397   : > { %v567_v11 = vadd.f32 %v566_v10, %v565_v9 }
 0x399   : > { %v568_v12 = vrot.slane %v567_v11, 1 }
 0x39b   : > { %v569_v13 = vadd.f32 %v568_v12, %v567_v11 }
 0x39d   : > { %570 = vst [vmem:[%s204_s27] sm:$0x1] %v569_v13 }
 0x39e   : > { %882 = shalt.err (!%p879_p3)
}
 0x39f   : > { %s883_s9 = scalar_lea.hbm %s582_s4, 16  ;;  %s887_s18 = scalar_lea.hbm %s1117_s3, 32 }
 0x3a0   : > { %p884_p5 = scmp.ne.s32.totalorder %s582_s4, %s883_s9  ;;  %p888_p9 = scmp.lt.s32.totalorder %s582_s4, %s1117_s3 }
 0x3a1   : > { %p889_p10 = scmp.lt.s32.totalorder %s887_s18, %s883_s9 }
 0x3a2   : > { %p885_p6 = pnand %p884_p5, %p1018_p4 }
 0x3a3   : > { %p890_p11 = por %p889_p10, %p888_p9 }
 0x3a4   : > { %p886_p7 = pneg %p885_p6 }
 0x3a6   : > { %p891_p12 = pnand %p890_p11, %p886_p7 }
 0x3a8   : > { %894 = shalt.err (!%p891_p12)
}
 0x3a9   : > { %740 = dma.vmem_to_hbm [thread:$0]  (%p1018_p4), %s585_s28, 16, %s582_s4, %s572_s5  }
 0x3aa PF: > { %p752_p13 = scmp.ge.s32.totalorder %s949_s17, 2  ;;  %s596_s23 = sand.u32 1, %s929_s12  }
 0x3ab   : > { %s597_s26 = scalar_lea.sflag [#allocation5], %s596_s23 }
 0x3ac   : > { %p747_p0 = pnand %p752_p13, %p1025_p8 }
 0x3ae   : > { %p748_p1 = pneg %p747_p0 }
 0x3b0   : > { %924 = dma.done.wait (%p748_p1), %s597_s26, 16  }
 0x3b1   : > { %926 = vsyncadd (%p748_p1), %s597_s26, 4294967280  ;;  %s17_s17 = sadd.s32 1, %s949_s17   ;;  %s1122_s12 = smov %s933_s13 }
 0x3b2   : > { %p14_p2 = scmp.ge.s32.totalorder %s17_s17, 4   ;;  %s1123_s13 = smov %s937_s14 }
 0x3b3   : > { %s1124_s14 = smov %s1031_s25  ;;  %s1125_s15 = smov %s945_s16 }
 0x3b4   : > { %s1126_s16 = smov %s1128_s20  ;;  %16 = sbr.rel (!%p14_p2) target bundleno = 5 (0x5), region = 81 }
 0x3b9   :  { %601 = vsyncpa [#allocation4], 1 }
 0x3ba   :  { %603 = vsyncpa [#allocation4 + $0x1], 1 }
 0x3bb   :  { %604 = vsyncpa [#allocation5], 1 }
 0x3bc   :  { %606 = vsyncpa [#allocation5 + $0x1], 1 }

</bundles_post_ra>
